<compile_context>
chip_gen: v7x
topology: tpu7x:2x2x1
jax: 0.10.0
libtpu: 0.0.40
codegen_flags: <defaults>
</compile_context>

<pallas_src>
import jax
import jax.numpy as jnp
from jax import lax
from jax.experimental import pallas as pl
from jax.experimental.pallas import tpu as pltpu


def _round_up(x: int, m: int) -> int:
    return (x + m - 1) // m * m


def _pad_to(x, target_shape):
    pads = [(0, t - s) for s, t in zip(x.shape, target_shape)]
    if all(p == (0, 0) for p in pads):
        return x
    return jnp.pad(x, pads)


def attention_head_kernel(q_ref, k_ref, v_ref,
                          wq_ref, bq_ref, wk_ref, bk_ref, wv_ref, bv_ref,
                          o_ref, k_scr, v_scr):
    # Grid = (batch, outer q-tile, inner q-tile); the inner axis is
    # "arbitrary" (sequential on a core), so projected K/V written at
    # inner == 0 stay valid for every later q tile of this (batch, outer).
    @pl.when(pl.program_id(2) == 0)
    def _():
        k = jnp.dot(k_ref[0], wk_ref[...],
                    preferred_element_type=jnp.float32) + bk_ref[...]
        v = jnp.dot(v_ref[0], wv_ref[...],
                    preferred_element_type=jnp.float32) + bv_ref[...]
        k_scr[...] = k.astype(jnp.bfloat16)
        v_scr[...] = v.astype(jnp.bfloat16)

    # q projection (bf16 operands, fp32 accumulation).  The 1/sqrt(dim_q)
    # scale is already folded into wq / bq on the host.
    q = jnp.dot(q_ref[0], wq_ref[...],
                preferred_element_type=jnp.float32) + bq_ref[...]
    q = q.astype(jnp.bfloat16)

    # scores = q @ K^T as an 'nt' matmul (contract last dims; no XLU
    # transpose, no materialized k.T), bf16 in / fp32 out.
    scores = lax.dot_general(q, k_scr[...], (((1,), (1,)), ((), ())),
                             preferred_element_type=jnp.float32)

    # Numerically stable softmax over keys, kept in fp32.
    scores = scores - jnp.max(scores, axis=-1, keepdims=True)
    p = jnp.exp(scores)
    p = p * pl.reciprocal(jnp.sum(p, axis=-1, keepdims=True), approx=True)

    # PV matmul on bf16 operands, fp32 accumulation.
    o_ref[0] = jnp.dot(p.astype(jnp.bfloat16), v_scr[...],
                       preferred_element_type=jnp.float32).astype(o_ref.dtype)


def attention_head(query, key, value, wq, bq, wk, bk, wv, bv, *,
                   tq_max=512, single_buffer_params=False):
    B, S, dim_in = query.shape
    dim_q = wq.shape[1]
    dim_k = wk.shape[1]
    assert dim_q == dim_k, "q.bmm(k.T) requires dim_q == dim_k"
    assert wv.shape[1] == dim_k
    out_dtype = query.dtype

    # Fold 1/sqrt(dim_q) (PyTorch: projected query width) into the q weights.
    inv_scale = 1.0 / (float(dim_q) ** 0.5)
    wq = wq * inv_scale
    bq = bq * inv_scale

    # --- pad feature dims to multiples of 128 (lane-dense MXU / stores),
    #     cast MXU operands to bf16 (halves DMA too); biases stay fp32. ---
    d_in_p = _round_up(dim_in, 128)
    d_q_p = _round_up(dim_q, 128)
    d_k_p = _round_up(dim_k, 128)

    query_p = _pad_to(query, (B, S, d_in_p)).astype(jnp.bfloat16)
    key_p = _pad_to(key, (B, S, d_in_p)).astype(jnp.bfloat16)
    value_p = _pad_to(value, (B, S, d_in_p)).astype(jnp.bfloat16)
    wq_p = _pad_to(wq, (d_in_p, d_q_p)).astype(jnp.bfloat16)
    wk_p = _pad_to(wk, (d_in_p, d_q_p)).astype(jnp.bfloat16)
    wv_p = _pad_to(wv, (d_in_p, d_k_p)).astype(jnp.bfloat16)
    bq_p = _pad_to(bq.reshape(1, -1), (1, d_q_p)).astype(jnp.float32)
    bk_p = _pad_to(bk.reshape(1, -1), (1, d_q_p)).astype(jnp.float32)
    bv_p = _pad_to(bv.reshape(1, -1), (1, d_k_p)).astype(jnp.float32)

    n_param_bufs = 1 if single_buffer_params else 2

    # --- explicit VMEM budget (bytes) for a given query-tile size ---
    def vmem_budget(tq_):
        return int(
            2 * tq_ * d_in_p * 2                       # q tile, double-buffered (bf16)
            + 2 * 2 * S * d_in_p * 2                   # full-S K,V blocks, double-buffered
            + n_param_bufs * 3 * (d_in_p * d_q_p * 2 + d_q_p * 4)  # weights + biases
            + 2 * tq_ * d_k_p * out_dtype.itemsize     # output tile, double-buffered
            + S * (d_q_p + d_k_p) * 2                  # projected K/V scratch (bf16)
            + 4 * tq_ * S * 4                          # fp32 score / softmax temporaries
            + 2 * tq_ * d_q_p * 4)                     # projected-q temporaries

    # --- choose query-tile size; shrink for long S so the full-S resident
    #     design stays under ~48 MiB (fits v7x's 64 MiB physical VMEM). ---
    tq = min(tq_max, _round_up(S, 8))
    while tq > 128 and vmem_budget(tq) > 48 * 1024 * 1024:
        tq = max(128, _round_up(tq // 2, 8))
    # TODO(synk): for S large enough that the full-S K/V residency itself
    # blows the budget, switch to a key-tiled (flash-style) online softmax.

    n_q_tiles = pl.cdiv(S, tq)
    # Megacore / v7x 2-TC: if batch == 1, split q tiles over an extra
    # parallel axis so both cores get work (each recomputes K/V once).
    n_outer = 2 if (B == 1 and n_q_tiles >= 2) else 1
    n_inner = pl.cdiv(n_q_tiles, n_outer)
    s_q = n_outer * n_inner * tq
    query_p = _pad_to(query_p, (B, s_q, d_in_p))

    vmem_limit = int(min(max(1.5 * vmem_budget(tq), 32 * 1024 * 1024),
                         100 * 1024 * 1024))

    # --- BlockSpecs ---
    def q_idx(b, o, i):
        return (b, o * n_inner + i, 0)

    q_spec = pl.BlockSpec((1, tq, d_in_p), q_idx)
    kv_spec = pl.BlockSpec((1, S, d_in_p), lambda b, o, i: (b, 0, 0))
    out_spec = pl.BlockSpec((1, tq, d_k_p), q_idx)

    def const_spec(shape):
        idx = lambda b, o, i: (0,) * len(shape)
        if single_buffer_params:
            # Grid-invariant operands: the second pipeline buffer is pure
            # VMEM waste, reclaim it.
            return pl.BlockSpec(shape, idx, pipeline_mode=pl.Buffered(1))
        return pl.BlockSpec(shape, idx)

    # --- advisory cost estimate for the XLA scheduler ---
    flops = (2 * B * S * dim_in * (dim_q + 2 * dim_k)          # projections
             + 2 * B * S * S * (dim_q + dim_k))                # QK^T + PV
    cost = pl.CostEstimate(
        flops=flops,
        transcendentals=B * S * S,
        bytes_accessed=(3 * B * S * d_in_p * 2
                        + 3 * d_in_p * d_q_p * 2
                        + B * S * dim_k * out_dtype.itemsize))

    out_p = pl.pallas_call(
        attention_head_kernel,
        out_shape=jax.ShapeDtypeStruct((B, s_q, d_k_p), out_dtype),
        grid_spec=pltpu.PrefetchScalarGridSpec(
            num_scalar_prefetch=0,
            grid=(B, n_outer, n_inner),
            in_specs=[
                q_spec, kv_spec, kv_spec,                        # query, key, value
                const_spec(wq_p.shape), const_spec(bq_p.shape),  # q projection
                const_spec(wk_p.shape), const_spec(bk_p.shape),  # k projection
                const_spec(wv_p.shape), const_spec(bv_p.shape),  # v projection
            ],
            out_specs=out_spec,
            scratch_shapes=[
                pltpu.VMEM((S, d_q_p), jnp.bfloat16),   # projected K (resident)
                pltpu.VMEM((S, d_k_p), jnp.bfloat16),   # projected V (resident)
            ]),
        compiler_params=pltpu.CompilerParams(
            dimension_semantics=("parallel", "parallel", "arbitrary"),
            vmem_limit_bytes=vmem_limit),
        cost_estimate=cost,
    )(query_p, key_p, value_p, wq_p, bq_p, wk_p, bk_p, wv_p, bv_p)

    # Drop sequence / feature padding.
    return out_p[:, :S, :dim_k]


def attention_head_ref(query, key, value, wq, bq, wk, bk, wv, bv):
    q = query @ wq + bq
    k = key @ wk + bk
    v = value @ wv + bv
    scale = q.shape[-1] ** 0.5
    scores = jnp.einsum("bqd,bkd->bqk", q, k) / scale
    p = jax.nn.softmax(scores, axis=-1)
    return jnp.einsum("bqk,bkd->bqd", p, v)


if __name__ == "__main__":
    # Small shapes consistent with the module: batch=2, seq=8,
    # dim_in=32, dim_q=dim_k=32 (dim_q must equal dim_k for q @ k^T).
    B, S, dim_in, dim_q, dim_k = 2, 8, 32, 32, 32

    key0 = jax.random.PRNGKey(0)
    keys = jax.random.split(key0, 9)

    query = jax.random.normal(keys[0], (B, S, dim_in), jnp.float32)
    key_t = jax.random.normal(keys[1], (B, S, dim_in), jnp.float32)
    value = jax.random.normal(keys[2], (B, S, dim_in), jnp.float32)

    # Deterministic parameter init (stored as (in, out); bias as (1, out)).
    wq = jax.random.normal(keys[3], (dim_in, dim_q), jnp.float32) * 0.1
    bq = jax.random.normal(keys[4], (1, dim_q), jnp.float32) * 0.1
    wk = jax.random.normal(keys[5], (dim_in, dim_k), jnp.float32) * 0.1
    bk = jax.random.normal(keys[6], (1, dim_k), jnp.float32) * 0.1
    wv = jax.random.normal(keys[7], (dim_in, dim_k), jnp.float32) * 0.1
    bv = jax.random.normal(keys[8], (1, dim_k), jnp.float32) * 0.1

    out = attention_head(query, key_t, value, wq, bq, wk, bk, wv, bv)
    out = jax.block_until_ready(out)

    ref = attention_head_ref(query, key_t, value, wq, bq, wk, bk, wv, bv)
    assert out.shape == (B, S, dim_k)
    # bf16 MXU operands + EUP approx reciprocal loosen numerics vs fp32 ref.
    assert jnp.allclose(out, ref, atol=2e-2, rtol=2e-2), "mismatch vs reference"

    print("KERNEL_OK")
</pallas_src>

<mosaic_0001>
module attributes {stable_mosaic.version = 11 : i64} {
  func.func @attention_head_kernel(%arg0: i32, %arg1: i32, %arg2: i32, %arg3: memref<1x8x128xbf16, #tpu.memory_space<vmem>>, %arg4: memref<1x8x128xbf16, #tpu.memory_space<vmem>>, %arg5: memref<1x8x128xbf16, #tpu.memory_space<vmem>>, %arg6: memref<128x128xbf16, #tpu.memory_space<vmem>>, %arg7: memref<1x128xf32, #tpu.memory_space<vmem>>, %arg8: memref<128x128xbf16, #tpu.memory_space<vmem>>, %arg9: memref<1x128xf32, #tpu.memory_space<vmem>>, %arg10: memref<128x128xbf16, #tpu.memory_space<vmem>>, %arg11: memref<1x128xf32, #tpu.memory_space<vmem>>, %arg12: memref<1x8x128xf32, #tpu.memory_space<vmem>>, %arg13: memref<8x128xbf16, #tpu.memory_space<vmem>>, %arg14: memref<8x128xbf16, #tpu.memory_space<vmem>>) attributes {dimension_semantics = [#tpu.dimension_semantics<parallel>, #tpu.dimension_semantics<parallel>, #tpu.dimension_semantics<arbitrary>], iteration_bounds = array<i64: 2, 1, 1>, scalar_prefetch = 0 : i64, scratch_operands = 2 : i64, tpu.core_type = #tpu.core_type<tc>, window_params = [{transform_indices = @transform_0, window_bounds = array<i64: 1, 8, 128>}, {transform_indices = @transform_1, window_bounds = array<i64: 1, 8, 128>}, {transform_indices = @transform_2, window_bounds = array<i64: 1, 8, 128>}, {pipeline_mode = #tpu.pipeline_mode<synchronous>, transform_indices = @transform_3, window_bounds = array<i64: 128, 128>}, {pipeline_mode = #tpu.pipeline_mode<synchronous>, transform_indices = @transform_4, window_bounds = array<i64: 1, 128>}, {pipeline_mode = #tpu.pipeline_mode<synchronous>, transform_indices = @transform_5, window_bounds = array<i64: 128, 128>}, {pipeline_mode = #tpu.pipeline_mode<synchronous>, transform_indices = @transform_6, window_bounds = array<i64: 1, 128>}, {pipeline_mode = #tpu.pipeline_mode<synchronous>, transform_indices = @transform_7, window_bounds = array<i64: 128, 128>}, {pipeline_mode = #tpu.pipeline_mode<synchronous>, transform_indices = @transform_8, window_bounds = array<i64: 1, 128>}, {transform_indices = @transform_9, window_bounds = array<i64: 1, 8, 128>}]} {
    %c0_i32 = arith.constant 0 : i32
    %0 = arith.cmpi eq, %arg2, %c0_i32 : i32
    %1 = arith.extui %0 : i1 to i32
    %c0_i32_0 = arith.constant 0 : i32
    %2 = arith.cmpi ne, %1, %c0_i32_0 : i32
    scf.if %2 {
      %c0_18 = arith.constant 0 : index
      %c0_19 = arith.constant 0 : index
      %c0_20 = arith.constant 0 : index
      %29 = vector.load %arg4[%c0_18, %c0_19, %c0_20] : memref<1x8x128xbf16, #tpu.memory_space<vmem>>, vector<1x8x128xbf16>
      %30 = vector.shape_cast %29 : vector<1x8x128xbf16> to vector<8x128xbf16>
      %c0_21 = arith.constant 0 : index
      %c0_22 = arith.constant 0 : index
      %31 = vector.load %arg8[%c0_21, %c0_22] : memref<128x128xbf16, #tpu.memory_space<vmem>>, vector<128x128xbf16>
      %cst_23 = arith.constant dense<0.000000e+00> : vector<8x128xf32>
      %32 = tpu.matmul %30, %31, %cst_23 {dimension_numbers = #tpu.dot_dimension_numbers<[1], [0], [0], [1], [0, 0, 1, 1], [], []>} : vector<8x128xbf16>, vector<128x128xbf16>, vector<8x128xf32> -> vector<8x128xf32>
      %c0_24 = arith.constant 0 : index
      %c0_25 = arith.constant 0 : index
      %33 = vector.load %arg9[%c0_24, %c0_25] : memref<1x128xf32, #tpu.memory_space<vmem>>, vector<1x128xf32>
      %34 = vector.broadcast %33 : vector<1x128xf32> to vector<8x128xf32>
      %35 = arith.addf %32, %34 : vector<8x128xf32>
      %c0_26 = arith.constant 0 : index
      %c0_27 = arith.constant 0 : index
      %c0_28 = arith.constant 0 : index
      %36 = vector.load %arg5[%c0_26, %c0_27, %c0_28] : memref<1x8x128xbf16, #tpu.memory_space<vmem>>, vector<1x8x128xbf16>
      %37 = vector.shape_cast %36 : vector<1x8x128xbf16> to vector<8x128xbf16>
      %c0_29 = arith.constant 0 : index
      %c0_30 = arith.constant 0 : index
      %38 = vector.load %arg10[%c0_29, %c0_30] : memref<128x128xbf16, #tpu.memory_space<vmem>>, vector<128x128xbf16>
      %cst_31 = arith.constant dense<0.000000e+00> : vector<8x128xf32>
      %39 = tpu.matmul %37, %38, %cst_31 {dimension_numbers = #tpu.dot_dimension_numbers<[1], [0], [0], [1], [0, 0, 1, 1], [], []>} : vector<8x128xbf16>, vector<128x128xbf16>, vector<8x128xf32> -> vector<8x128xf32>
      %c0_32 = arith.constant 0 : index
      %c0_33 = arith.constant 0 : index
      %40 = vector.load %arg11[%c0_32, %c0_33] : memref<1x128xf32, #tpu.memory_space<vmem>>, vector<1x128xf32>
      %41 = vector.broadcast %40 : vector<1x128xf32> to vector<8x128xf32>
      %42 = arith.addf %39, %41 : vector<8x128xf32>
      %43 = arith.truncf %35 : vector<8x128xf32> to vector<8x128xbf16>
      %c0_34 = arith.constant 0 : index
      %c0_35 = arith.constant 0 : index
      %44 = vector.load %arg13[%c0_34, %c0_35] : memref<8x128xbf16, #tpu.memory_space<vmem>>, vector<8x128xbf16>
      tpu.vector_store %arg13[%c0_34, %c0_35], %43 {strides = array<i32>} : memref<8x128xbf16, #tpu.memory_space<vmem>>, vector<8x128xbf16>,
      %45 = arith.truncf %42 : vector<8x128xf32> to vector<8x128xbf16>
      %c0_36 = arith.constant 0 : index
      %c0_37 = arith.constant 0 : index
      %46 = vector.load %arg14[%c0_36, %c0_37] : memref<8x128xbf16, #tpu.memory_space<vmem>>, vector<8x128xbf16>
      tpu.vector_store %arg14[%c0_36, %c0_37], %45 {strides = array<i32>} : memref<8x128xbf16, #tpu.memory_space<vmem>>, vector<8x128xbf16>,
    } else {
    }
    %c0 = arith.constant 0 : index
    %c0_1 = arith.constant 0 : index
    %c0_2 = arith.constant 0 : index
    %3 = vector.load %arg3[%c0, %c0_1, %c0_2] : memref<1x8x128xbf16, #tpu.memory_space<vmem>>, vector<1x8x128xbf16>
    %4 = vector.shape_cast %3 : vector<1x8x128xbf16> to vector<8x128xbf16>
    %c0_3 = arith.constant 0 : index
    %c0_4 = arith.constant 0 : index
    %5 = vector.load %arg6[%c0_3, %c0_4] : memref<128x128xbf16, #tpu.memory_space<vmem>>, vector<128x128xbf16>
    %cst = arith.constant dense<0.000000e+00> : vector<8x128xf32>
    %6 = tpu.matmul %4, %5, %cst {dimension_numbers = #tpu.dot_dimension_numbers<[1], [0], [0], [1], [0, 0, 1, 1], [], []>} : vector<8x128xbf16>, vector<128x128xbf16>, vector<8x128xf32> -> vector<8x128xf32>
    %c0_5 = arith.constant 0 : index
    %c0_6 = arith.constant 0 : index
    %7 = vector.load %arg7[%c0_5, %c0_6] : memref<1x128xf32, #tpu.memory_space<vmem>>, vector<1x128xf32>
    %8 = vector.broadcast %7 : vector<1x128xf32> to vector<8x128xf32>
    %9 = arith.addf %6, %8 : vector<8x128xf32>
    %10 = arith.truncf %9 : vector<8x128xf32> to vector<8x128xbf16>
    %c0_7 = arith.constant 0 : index
    %c0_8 = arith.constant 0 : index
    %11 = vector.load %arg13[%c0_7, %c0_8] : memref<8x128xbf16, #tpu.memory_space<vmem>>, vector<8x128xbf16>
    %cst_9 = arith.constant dense<0.000000e+00> : vector<8x8xf32>
    %12 = tpu.matmul %10, %11, %cst_9 {dimension_numbers = #tpu.dot_dimension_numbers<[1], [1], [0], [0], [0, 0, 1, 0], [], []>} : vector<8x128xbf16>, vector<8x128xbf16>, vector<8x8xf32> -> vector<8x8xf32>
    %cst_10 = arith.constant dense<0xFF800000> : vector<8xf32>
    %13 = vector.multi_reduction <maximumf>, %12, %cst_10 [1] : vector<8x8xf32> to vector<8xf32>
    %14 = vector.shape_cast %13 : vector<8xf32> to vector<8x1xf32>
    %15 = vector.broadcast %14 : vector<8x1xf32> to vector<8x8xf32>
    %16 = arith.subf %12, %15 : vector<8x8xf32>
    %17 = math.exp %16 : vector<8x8xf32>
    %cst_11 = arith.constant dense<0.000000e+00> : vector<8xf32>
    %18 = vector.multi_reduction <add>, %17, %cst_11 [1] : vector<8x8xf32> to vector<8xf32>
    %19 = vector.shape_cast %18 : vector<8xf32> to vector<8x1xf32>
    %20 = tpu.reciprocal %19 {approx = true} : vector<8x1xf32> -> vector<8x1xf32>
    %21 = vector.broadcast %20 : vector<8x1xf32> to vector<8x8xf32>
    %22 = arith.mulf %17, %21 : vector<8x8xf32>
    %23 = arith.truncf %22 : vector<8x8xf32> to vector<8x8xbf16>
    %c0_12 = arith.constant 0 : index
    %c0_13 = arith.constant 0 : index
    %24 = vector.load %arg14[%c0_12, %c0_13] : memref<8x128xbf16, #tpu.memory_space<vmem>>, vector<8x128xbf16>
    %cst_14 = arith.constant dense<0.000000e+00> : vector<8x128xf32>
    %25 = tpu.matmul %23, %24, %cst_14 {dimension_numbers = #tpu.dot_dimension_numbers<[1], [0], [0], [1], [0, 0, 1, 1], [], []>} : vector<8x8xbf16>, vector<8x128xbf16>, vector<8x128xf32> -> vector<8x128xf32>
    %c0_15 = arith.constant 0 : index
    %c0_16 = arith.constant 0 : index
    %c0_17 = arith.constant 0 : index
    %26 = vector.load %arg12[%c0_15, %c0_16, %c0_17] : memref<1x8x128xf32, #tpu.memory_space<vmem>>, vector<1x8x128xf32>
    %27 = vector.shape_cast %26 : vector<1x8x128xf32> to vector<8x128xf32>
    %28 = vector.shape_cast %25 : vector<8x128xf32> to vector<1x8x128xf32>
    tpu.vector_store %arg12[%c0_15, %c0_16, %c0_17], %28 {strides = array<i32>} : memref<1x8x128xf32, #tpu.memory_space<vmem>>, vector<1x8x128xf32>,
    return
  }
  func.func @transform_0(%arg0: i32, %arg1: i32, %arg2: i32) -> (i32, i32, i32) {
    %c1_i32 = arith.constant 1 : i32
    %0 = arith.muli %arg1, %c1_i32 : i32
    %1 = arith.addi %0, %arg2 : i32
    %c0_i32 = arith.constant 0 : i32
    %c0_i32_0 = arith.constant 0 : i32
    return %arg0, %1, %c0_i32 : i32, i32, i32
  }
  func.func @transform_1(%arg0: i32, %arg1: i32, %arg2: i32) -> (i32, i32, i32) {
    %c0_i32 = arith.constant 0 : i32
    %c0_i32_0 = arith.constant 0 : i32
    %c0_i32_1 = arith.constant 0 : i32
    return %arg0, %c0_i32, %c0_i32_0 : i32, i32, i32
  }
  func.func @transform_2(%arg0: i32, %arg1: i32, %arg2: i32) -> (i32, i32, i32) {
    %c0_i32 = arith.constant 0 : i32
    %c0_i32_0 = arith.constant 0 : i32
    %c0_i32_1 = arith.constant 0 : i32
    return %arg0, %c0_i32, %c0_i32_0 : i32, i32, i32
  }
  func.func @transform_3(%arg0: i32, %arg1: i32, %arg2: i32) -> (i32, i32) {
    %c0_i32 = arith.constant 0 : i32
    %c0_i32_0 = arith.constant 0 : i32
    %c0_i32_1 = arith.constant 0 : i32
    return %c0_i32, %c0_i32_0 : i32, i32
  }
  func.func @transform_4(%arg0: i32, %arg1: i32, %arg2: i32) -> (i32, i32) {
    %c0_i32 = arith.constant 0 : i32
    %c0_i32_0 = arith.constant 0 : i32
    %c0_i32_1 = arith.constant 0 : i32
    return %c0_i32, %c0_i32_0 : i32, i32
  }
  func.func @transform_5(%arg0: i32, %arg1: i32, %arg2: i32) -> (i32, i32) {
    %c0_i32 = arith.constant 0 : i32
    %c0_i32_0 = arith.constant 0 : i32
    %c0_i32_1 = arith.constant 0 : i32
    return %c0_i32, %c0_i32_0 : i32, i32
  }
  func.func @transform_6(%arg0: i32, %arg1: i32, %arg2: i32) -> (i32, i32) {
    %c0_i32 = arith.constant 0 : i32
    %c0_i32_0 = arith.constant 0 : i32
    %c0_i32_1 = arith.constant 0 : i32
    return %c0_i32, %c0_i32_0 : i32, i32
  }
  func.func @transform_7(%arg0: i32, %arg1: i32, %arg2: i32) -> (i32, i32) {
    %c0_i32 = arith.constant 0 : i32
    %c0_i32_0 = arith.constant 0 : i32
    %c0_i32_1 = arith.constant 0 : i32
    return %c0_i32, %c0_i32_0 : i32, i32
  }
  func.func @transform_8(%arg0: i32, %arg1: i32, %arg2: i32) -> (i32, i32) {
    %c0_i32 = arith.constant 0 : i32
    %c0_i32_0 = arith.constant 0 : i32
    %c0_i32_1 = arith.constant 0 : i32
    return %c0_i32, %c0_i32_0 : i32, i32
  }
  func.func @transform_9(%arg0: i32, %arg1: i32, %arg2: i32) -> (i32, i32, i32) {
    %c1_i32 = arith.constant 1 : i32
    %0 = arith.muli %arg1, %c1_i32 : i32
    %1 = arith.addi %0, %arg2 : i32
    %c0_i32 = arith.constant 0 : i32
    %c0_i32_0 = arith.constant 0 : i32
    return %arg0, %1, %c0_i32 : i32, i32, i32
  }
}

</mosaic_0001>

<bundles_post_ra>
// kernel: tpu_custom_call.1
= control target key start
LH: loop header
LB: loop body
LE: loop exit
PB: predicated region body
PF: predicated region fallthrough
CT: control target
= control target key end

     0   :  { %s2132_s0 = inlined_call_operand.hbm [shape: bf16[2,8,128], index: 0, kind: input, shape index: {}]   ;;  %s2133_s1 = inlined_call_operand.hbm [shape: bf16[2,8,128], index: 1, kind: input, shape index: {}]   ;;  %s2134_s2 = inlined_call_operand.hbm [shape: bf16[2,8,128], index: 2, kind: input, shape index: {}]   ;;  %s2135_s3 = inlined_call_operand.hbm [shape: bf16[128,128], index: 3, kind: input, shape index: {}]   ;;  %s2136_s4 = inlined_call_operand.vmem [shape: f32[1,128], index: 4, kind: input, shape index: {}]   ;;  %s2137_s5 = inlined_call_operand.hbm [shape: bf16[128,128], index: 5, kind: input, shape index: {}]   ;;  %s2138_s6 = inlined_call_operand.vmem [shape: f32[1,128], index: 6, kind: input, shape index: {}]   ;;  %s2139_s7 = inlined_call_operand.hbm [shape: bf16[128,128], index: 7, kind: input, shape index: {}]   ;;  %s2140_s8 = inlined_call_operand.vmem [shape: f32[1,128], index: 8, kind: input, shape index: {}]   ;;  %s2141_s9 = inlined_call_operand.hbm [shape: f32[2,8,128], index: 9, kind: output, shape index: {}]  }
   0x1   :  { %2168 = sst [smem:[#allocation29_spill]] %s2133_s1 }
   0x2   :  { %2169 = sst [smem:[#allocation30_spill]] %s2135_s3 }
   0x3   :  { %2170 = sst [smem:[#allocation31_spill]] %s2136_s4 }
   0x4   :  { %2171 = sst [smem:[#allocation32_spill]] %s2140_s8 }
   0x5   :  { %2172 = sst [smem:[#allocation33_spill]] %s2141_s9 }
   0x6   :  { %14 = vsyncpa [#allocation5], 0 }
   0x7   :  { %16 = vsyncpa [#allocation5 + $0x1], 0 }
   0x8   :  { %17 = vsyncpa [#allocation8], 0 }
   0x9   :  { %19 = vsyncpa [#allocation8 + $0x1], 0 }
   0xa   :  { %20 = vsyncpa [#allocation11], 0 }
   0xb   :  { %21 = vsyncpa [#allocation14], 0 }
   0xc   :  { %22 = vsyncpa [#allocation6], 0 }
   0xd   :  { %24 = vsyncpa [#allocation6 + $0x1], 0  ;;  %s1738_s30 = smov 0   ;;  %s1740_s10 = smov 0  }
   0xe   :  { %s1742_s11 = smov 0   ;;  %s1744_s12 = smov 0  }
   0xf   :  { %s1746_s13 = smov 0   ;;  %s1748_s14 = smov 0  }
  0x10 LB: > { %2173 = sst [smem:[#allocation21_spill]] %s1655_s30  ;;  %s1769_s15 = sadd.s32 4294967295, %s1675_s14   ;;  %s1675_s14 = sphi %s1748_s14, %s30_s14   ;;  %s1671_s13 = sphi %s1746_s13, %s2219_s13   ;;  %s1667_s12 = sphi %s1744_s12, %s2218_s12   ;;  %s1663_s11 = sphi %s1742_s11, %s2222_s11   ;;  %s1659_s10 = sphi %s1740_s10, %s2221_s10   ;;  %s1655_s30 = sphi %s1738_s30, %s2220_s30  }
  0x11   : > { %2174 = sst [smem:[#allocation22_spill]] %s1667_s12  ;;  %s1117_s16 = sadd.s32 4294967294, %s1675_s14  }
  0x12   : > { %2175 = sst [smem:[#allocation23_spill]] %s1671_s13  ;;  %p73_p0 = scmp.ne.s32.totalorder %s1659_s10, %s1655_s30 }
  0x13   : > { %2176 = sst [smem:[#allocation24_spill]] %s1675_s14  ;;  %p2142_p1 = scmp.eq.s32.totalorder %s1769_s15, 0 }
  0x14   : > { %p285_p3 = scmp.eq.s32.totalorder %s1117_s16, 1  ;;  %p1118_p5 = scmp.ge.s32.totalorder %s1675_s14, 1 }
  0x15   : > { %p1778_p4 = por %p2142_p1, %p73_p0  ;;  %p292_p7 = scmp.lt.s32.totalorder %s1675_s14, 3 }
  0x16   : > { %p1783_p6 = por %p285_p3, %p73_p0  ;;  %s1677_s20 = smov [#allocation10]  }
  0x17   : > { %s2177_s17 = scalar_select %p1778_p4, 1, 0 }
  0x18   : > { %s2178_s18 = scalar_select %p1783_p6, 1, 0 }
  0x19   : > { %p1788_p8 = pnand %p1118_p5, %p292_p7  ;;  %s304_s21 = sshll.u32 %s1677_s20, 4  ;;  %s305_s21 = int_to_ptr.vmem [resolvable:$true] %s304_s21 }
  0x1a   : > { %2179 = sst [smem:[#allocation25_spill]] %s2178_s18  ;;  %s49_s23 = sadd.s32 1, %s1671_s13 }
  0x1b   : > { %s2180_s19 = scalar_select %p1788_p8, 1, 0 }
  0x1c   : > { %p1292_p9 = pneg %p1788_p8  ;;  %s2182_s3 = sld [smem:[#allocation30_spill]] }
  0x1e   : > { %p1797_p11 = pnand %p1292_p9, %p2142_p1 }
  0x20   : > { %s2181_s22 = scalar_select %p1797_p11, 1, 0 }
  0x21   : > { %p1810_p13 = pneg %p1797_p11 }
  0x22   : > { %s1407_s26 = scalar_lea.hbm %s2182_s3, 1024 }
  0x23   : > { %p1408_p12 = scmp.ne.s32.totalorder %s2182_s3, %s1407_s26  ;;  %p1414_p5 = scmp.lt.u32.totalorder %s1407_s26, %s2182_s3 }
  0x24   : > { %s2183_s29 = scalar_select %p1810_p13, 1, 0 }
  0x25   : > { %p1410_p0 = pnand %p1810_p13, %p1408_p12 }
  0x27   : > { %p1411_p3 = pneg %p1410_p0 }
  0x29   : > { %p1416_p7 = pnand %p1414_p5, %p1411_p3 }
  0x2b   : > { %1419 = shalt.err (!%p1416_p7)
}
  0x2c   : > { %s1420_s24 = scalar_lea.vmem %s305_s21, 1024  ;;  %p1428_p2 = scmp.lt.s32.totalorder %s305_s21, %s305_s21 }
  0x2d   : > { %p1421_p9 = scmp.ne.s32.totalorder %s305_s21, %s1420_s24  ;;  %p1429_p6 = scmp.lt.s32.totalorder %s1420_s24, %s1420_s24 }
  0x2f   : > { %p1423_p10 = pnand %p1421_p9, %p1810_p13  ;;  %p1430_p4 = por %p1429_p6, %p1428_p2 }
  0x31   : > { %p1424_p1 = pneg %p1423_p10 }
  0x33   : > { %p1431_p8 = pnand %p1430_p4, %p1424_p1 }
  0x35   : > { %1434 = shalt.err (!%p1431_p8)
}
  0x36   : > { %s2146_s25 = smov 64   ;;  %s2148_s26 = smov 4  }
  0x37   : > { %1295 = dma.hbm_to_vmem [thread:$0]  (!%p1797_p11), %s2182_s3, 1024, %s305_s21, [#allocation11], %s2146_s25, %s2146_s25, %s2148_s26  }
  0x38   : > { %p51_p1 = scmp.ge.s32.totalorder %s49_s23, 2  ;;  %s60_s16 = sadd.s32 1, %s1663_s11 }
  0x39   : > { %p67_p2 = scmp.ne.s32.totalorder %s1663_s11, %s1659_s10  ;;  %p68_p4 = scmp.eq.s32.totalorder %s1675_s14, 0 }
  0x3a   : > { %s2224_s23 = smov (%p51_p1, %s49_s23), 0  ;;  %p2185_p8 = scmp.eq.s32.totalorder %s1769_s15, 1 }
  0x3b   : > { %2184 = sst [smem:[#allocation26_spill]] %s2224_s23  ;;  %p69_p6 = por %p68_p4, %p67_p2 }
  0x3c   : > { %p1837_p10 = por %p2185_p8, %p67_p2  ;;  %s55_s24 = ssub.s32 %s1671_s13, %s2224_s23 }
  0x3d   : > { %p1319_p12 = scmp.lt.s32.totalorder %s1675_s14, 2  ;;  %p58_p0 = scmp.eq.s32.totalorder %s55_s24, 0 }
  0x3e   : > { %s2186_s20 = scalar_select %p1837_p10, 1, 0 }
  0x3f   : > { %s2151_s18 = sand.u32 1, %s1663_s11   ;;  %s1850_s27 = sshll.u32 %s1671_s13, 6 }
  0x40   : > { %2187 = sst [smem:[#allocation27_spill]] %s2186_s20  ;;  %s1847_s21 = sshll.u32 %s2151_s18, 2 }
  0x41   : > { %s1853_s28 = scalar_select %p58_p0, %s1663_s11, %s60_s16  }
  0x42   : > { %p1855_p3 = pnand %p1319_p12, %p69_p6  ;;  %s373_s26 = sand.u32 1, %s1675_s14  }
  0x43   : > { %2188 = sst [smem:[#allocation28_spill]] %s1853_s28  ;;  %s2190_s1 = sld [smem:[#allocation29_spill]] }
  0x44   : > { %s2189_s25 = scalar_select %p1855_p3, 1, 0 }
  0x45   : > { %s377_s18 = scalar_lea.vmem [#allocation7], %s1847_s21  ;;  %s1680_s16 = smov [#allocation12]  }
  0x46   : > { %s384_s13 = sshll.u32 %s377_s18, 4  ;;  %s1869_s28 = sshll.u32 %s1680_s16, 4  ;;  %s1867_s13 = int_to_ptr.vmem [resolvable:$true] %s384_s13  ;;  %s321_s28 = int_to_ptr.vmem [resolvable:$true] %s1869_s28 }
  0x47   : > { %s1871_s30 = scalar_lea.sflag [#allocation8], %s373_s26  ;;  %p1877_p7 = pneg %p1855_p3 }
  0x49   : > { %s1864_s24 = scalar_lea.hbm %s2190_s1, %s1850_s27  ;;  %s1440_s14 = scalar_lea.hbm %s2190_s1, 128 }
  0x4a   : > { %s1435_s9 = scalar_lea.hbm %s1864_s24, 64  ;;  %p1441_p2 = scmp.lt.u32.totalorder %s1864_s24, %s2190_s1 }
  0x4b   : > { %p1436_p5 = scmp.ne.s32.totalorder %s1864_s24, %s1435_s9  ;;  %p1442_p4 = scmp.lt.u32.totalorder %s1440_s14, %s1435_s9 }
  0x4c   : > { %s2191_s3 = scalar_select %p1877_p7, 1, 0 }
  0x4d   : > { %p1438_p9 = pnand %p1877_p7, %p1436_p5  ;;  %p1443_p6 = por %p1442_p4, %p1441_p2 }
  0x4e   : > { %p1444_p8 = scmp.lt.u32.totalorder %s1435_s9, %s1864_s24 }
  0x4f   : > { %p1439_p1 = pneg %p1438_p9 }
  0x50   : > { %p1445_p12 = por %p1444_p8, %p1443_p6 }
  0x52   : > { %p1446_p0 = pnand %p1445_p12, %p1439_p1 }
  0x54   : > { %1449 = shalt.err (!%p1446_p0)
}
  0x55   : > { %s1450_s26 = scalar_lea.vmem %s1867_s13, 64  ;;  %s1681_s23 = smov [#allocation7]  }
  0x56   : > { %p1451_p5 = scmp.ne.s32.totalorder %s1867_s13, %s1450_s26  ;;  %s1455_s18 = sshll.u32 %s1681_s23, 4  ;;  %s1456_s18 = int_to_ptr.vmem [resolvable:$false] %s1455_s18 }
  0x57   : > { %s1457_s20 = scalar_lea.vmem %s1456_s18, 128  ;;  %p1458_p11 = scmp.lt.s32.totalorder %s1867_s13, %s1456_s18 }
  0x58   : > { %p1453_p9 = pnand %p1451_p5, %p1877_p7  ;;  %p1459_p13 = scmp.lt.s32.totalorder %s1457_s20, %s1450_s26 }
  0x5a   : > { %p1454_p10 = pneg %p1453_p9  ;;  %p1460_p2 = por %p1459_p13, %p1458_p11 }
  0x5c   : > { %p1461_p4 = pnand %p1460_p2, %p1454_p10 }
  0x5e   : > { %1464 = shalt.err (!%p1461_p4)
}
  0x5f   : > { %1308 = dma.hbm_to_vmem [thread:$0]  (!%p1855_p3), %s1864_s24, 64, %s1867_s13, %s1871_s30  }
  0x60   : > { %s1465_s16 = scalar_lea.hbm %s2137_s5, 1024  ;;  %p2192_p11 = scmp.ne.s32.totalorder %s2183_s29, 0 }
  0x61   : > { %p1466_p1 = scmp.ne.s32.totalorder %s2137_s5, %s1465_s16  ;;  %p1472_p6 = scmp.lt.u32.totalorder %s1465_s16, %s2137_s5 }
  0x63   : > { %p1468_p13 = pnand %p1466_p1, %p2192_p11 }
  0x65   : > { %p1469_p10 = pneg %p1468_p13 }
  0x67   : > { %p1474_p8 = pnand %p1472_p6, %p1469_p10 }
  0x69   : > { %1477 = shalt.err (!%p1474_p8)
}
  0x6a   : > { %s1478_s20 = scalar_lea.vmem %s321_s28, 1024  ;;  %p1486_p9 = scmp.lt.s32.totalorder %s321_s28, %s321_s28 }
  0x6b   : > { %p1479_p12 = scmp.ne.s32.totalorder %s321_s28, %s1478_s20  ;;  %p1487_p2 = scmp.lt.s32.totalorder %s1478_s20, %s1478_s20 }
  0x6d   : > { %p1481_p0 = pnand %p1479_p12, %p2192_p11  ;;  %p1488_p4 = por %p1487_p2, %p1486_p9 }
  0x6f   : > { %p1482_p5 = pneg %p1481_p0 }
  0x71   : > { %p1489_p3 = pnand %p1488_p4, %p1482_p5 }
  0x73   : > { %1492 = shalt.err (!%p1489_p3)
}
  0x74   : > { %p2193_p1 = scmp.ne.s32.totalorder %s2181_s22, 0  ;;  %s2194_s1 = smov 4  }
  0x75   : > { %s2195_s13 = smov 64   ;;  %s1682_s14 = smov [#allocation13]  }
  0x76   : > { %1298 = dma.hbm_to_vmem [thread:$0]  (!%p2193_p1), %s2137_s5, 1024, %s321_s28, [#allocation11], %s2195_s13, %s2195_s13, %s2194_s1  }
  0x77   : > { %s336_s16 = sshll.u32 %s1682_s14, 4  ;;  %s1493_s18 = scalar_lea.hbm %s2139_s7, 1024  ;;  %s337_s16 = int_to_ptr.vmem [resolvable:$true] %s336_s16 }
  0x78   : > { %p1494_p3 = scmp.ne.s32.totalorder %s2139_s7, %s1493_s18  ;;  %p1500_p6 = scmp.lt.u32.totalorder %s1493_s18, %s2139_s7 }
  0x7a   : > { %p1496_p13 = pnand %p1494_p3, %p2192_p11 }
  0x7c   : > { %p1497_p10 = pneg %p1496_p13 }
  0x7e   : > { %p1502_p8 = pnand %p1500_p6, %p1497_p10 }
  0x80   : > { %1505 = shalt.err (!%p1502_p8)
}
  0x81   : > { %s1506_s28 = scalar_lea.vmem %s337_s16, 1024  ;;  %p1514_p9 = scmp.lt.s32.totalorder %s337_s16, %s337_s16 }
  0x82   : > { %p1507_p12 = scmp.ne.s32.totalorder %s337_s16, %s1506_s28  ;;  %p1515_p2 = scmp.lt.s32.totalorder %s1506_s28, %s1506_s28 }
  0x84   : > { %p1509_p0 = pnand %p1507_p12, %p2192_p11  ;;  %p1516_p4 = por %p1515_p2, %p1514_p9 }
  0x86   : > { %p1510_p5 = pneg %p1509_p0 }
  0x88   : > { %p1517_p7 = pnand %p1516_p4, %p1510_p5 }
  0x8a   : > { %1520 = shalt.err (!%p1517_p7)
}
  0x8b   : > { %1301 = dma.hbm_to_vmem [thread:$0]  (!%p2193_p1), %s2139_s7, 1024, %s337_s16, [#allocation14], %s2195_s13, %s2195_s13, %s2194_s1  }
  0x8c   : > { %s1948_s24 = scalar_lea.hbm %s2132_s0, %s1850_s27  ;;  %s357_s22 = scalar_lea.vmem [#allocation4], %s1847_s21 }
  0x8d   : > { %s366_s9 = sshll.u32 %s357_s22, 4  ;;  %s2196_s14 = sand.u32 1, %s1663_s11   ;;  %s367_s9 = int_to_ptr.vmem [resolvable:$true] %s366_s9 }
  0x8e   : > { %s354_s23 = scalar_lea.sflag [#allocation5], %s2196_s14  ;;  %s1521_s26 = scalar_lea.hbm %s1948_s24, 64 }
  0x8f   : > { %p1522_p7 = scmp.ne.s32.totalorder %s1948_s24, %s1521_s26  ;;  %p2197_p11 = scmp.ne.s32.totalorder %s2191_s3, 0 }
  0x90   : > { %s1526_s16 = scalar_lea.hbm %s2132_s0, 128  ;;  %p1527_p1 = scmp.lt.u32.totalorder %s1948_s24, %s2132_s0 }
  0x91   : > { %p1524_p3 = pnand %p1522_p7, %p2197_p11  ;;  %p1528_p10 = scmp.lt.u32.totalorder %s1526_s16, %s1521_s26 }
  0x92   : > { %p1530_p8 = scmp.lt.u32.totalorder %s1521_s26, %s1948_s24 }
  0x93   : > { %p1525_p13 = pneg %p1524_p3  ;;  %p1529_p6 = por %p1528_p10, %p1527_p1 }
  0x95   : > { %p1531_p12 = por %p1530_p8, %p1529_p6 }
  0x97   : > { %p1532_p0 = pnand %p1531_p12, %p1525_p13 }
  0x99   : > { %1535 = shalt.err (!%p1532_p0)
}
  0x9a   : > { %s1536_s28 = scalar_lea.vmem %s367_s9, 64  ;;  %s1683_s4 = smov [#allocation4]  }
  0x9b   : > { %p1537_p5 = scmp.ne.s32.totalorder %s367_s9, %s1536_s28  ;;  %s1541_s8 = sshll.u32 %s1683_s4, 4  ;;  %s1542_s8 = int_to_ptr.vmem [resolvable:$false] %s1541_s8 }
  0x9c   : > { %s1543_s12 = scalar_lea.vmem %s1542_s8, 128  ;;  %p1544_p4 = scmp.lt.s32.totalorder %s367_s9, %s1542_s8 }
  0x9d   : > { %p1539_p9 = pnand %p1537_p5, %p2197_p11  ;;  %p1545_p7 = scmp.lt.s32.totalorder %s1543_s12, %s1536_s28 }
  0x9f   : > { %p1540_p2 = pneg %p1539_p9  ;;  %p1546_p3 = por %p1545_p7, %p1544_p4 }
  0xa1   : > { %p1547_p1 = pnand %p1546_p3, %p1540_p2 }
  0xa3   : > { %1550 = shalt.err (!%p1547_p1)
}
  0xa4   : > { %p2198_p10 = scmp.ne.s32.totalorder %s2189_s25, 0  ;;  %s1974_s14 = scalar_lea.hbm %s2134_s2, %s1850_s27 }
  0xa5   : > { %s395_s26 = scalar_lea.vmem [#allocation9], %s1847_s21  ;;  %s1551_s13 = scalar_lea.hbm %s1974_s14, 64 }
  0xa6   : > { %1305 = dma.hbm_to_vmem [thread:$0]  (!%p2198_p10), %s1948_s24, 64, %s367_s9, %s354_s23  }
  0xa7   : > { %s402_s1 = sshll.u32 %s395_s26, 4  ;;  %p1552_p13 = scmp.ne.s32.totalorder %s1974_s14, %s1551_s13  ;;  %s403_s1 = int_to_ptr.vmem [resolvable:$true] %s402_s1 }
  0xa8   : > { %s1556_s24 = scalar_lea.hbm %s2134_s2, 128  ;;  %p1557_p12 = scmp.lt.u32.totalorder %s1974_s14, %s2134_s2 }
  0xa9   : > { %p1554_p6 = pnand %p1552_p13, %p2197_p11  ;;  %p1558_p0 = scmp.lt.u32.totalorder %s1556_s24, %s1551_s13 }
  0xaa   : > { %p1560_p9 = scmp.lt.u32.totalorder %s1551_s13, %s1974_s14 }
  0xab   : > { %p1555_p8 = pneg %p1554_p6  ;;  %p1559_p5 = por %p1558_p0, %p1557_p12 }
  0xad   : > { %p1561_p2 = por %p1560_p9, %p1559_p5 }
  0xaf   : > { %p1562_p4 = pnand %p1561_p2, %p1555_p8 }
  0xb1   : > { %1565 = shalt.err (!%p1562_p4)
}
  0xb2   : > { %s1566_s21 = scalar_lea.vmem %s403_s1, 64  ;;  %s1684_s27 = smov [#allocation9]  }
  0xb3   : > { %p1567_p7 = scmp.ne.s32.totalorder %s403_s1, %s1566_s21  ;;  %s1571_s20 = sshll.u32 %s1684_s27, 4  ;;  %s1572_s20 = int_to_ptr.vmem [resolvable:$false] %s1571_s20 }
  0xb4   : > { %s1573_s28 = scalar_lea.vmem %s1572_s20, 128  ;;  %p1574_p13 = scmp.lt.s32.totalorder %s403_s1, %s1572_s20 }
  0xb5   : > { %p1569_p3 = pnand %p1567_p7, %p2197_p11  ;;  %p1575_p6 = scmp.lt.s32.totalorder %s1573_s28, %s1566_s21 }
  0xb7   : > { %p1570_p1 = pneg %p1569_p3  ;;  %p1576_p10 = por %p1575_p6, %p1574_p13 }
  0xb9   : > { %p1577_p0 = pnand %p1576_p10, %p1570_p1 }
  0xbb   : > { %1580 = shalt.err (!%p1577_p0)
}
  0xbc   : > { %p2199_p12 = scmp.ne.s32.totalorder %s2189_s25, 0  ;;  %p2200_p8 = scmp.ne.s32.totalorder %s2180_s19, 0 }
  0xbd   : > { %s1998_s3 = sand.u32 (!%p2200_p8), 1, %s1659_s10   ;;  %p2201_p11 = scmp.ne.s32.totalorder (!%p2200_p8), %s2177_s17, 0 }
  0xbe   : > { %1311 = dma.hbm_to_vmem [thread:$0]  (!%p2199_p12), %s1974_s14, 64, %s403_s1, %s1871_s30  }
  0xbf   : > { %411 = sbr.rel (%p2200_p8) target bundleno = 1246 (0x4de), region = 56  ;;  %s2001_s4 = sshll.u32 (!%p2200_p8), %s1998_s3, 2 }
  0xc0   : > { %s414_s8 = scalar_lea.sflag (!%p2200_p8), [#allocation5], %s1998_s3  ;;  %s417_s12 = scalar_lea.vmem (!%p2200_p8), [#allocation4], %s2001_s4 }
  0xc6   : > { %1634 = dma.done.wait (%p2201_p11), %s414_s8, 64  }
  0xc7   : > { %1636 = vsyncadd (%p2201_p11), %s414_s8, 4294967232  ;;  %s422_s30 = sand.u32 1, %s1769_s15   ;;  %s426_s25 = scalar_lea.vmem [#allocation7], %s2001_s4 }
  0xc8   : > { %s423_s19 = scalar_lea.sflag [#allocation8], %s422_s30 }
  0xc9   : > { %1638 = dma.done.wait (%p2201_p11), %s423_s19, 128  }
  0xca   : > { %1640 = vsyncadd (%p2201_p11), %s423_s19, 4294967168  ;;  %s435_s29 = scalar_lea.vmem [#allocation9], %s2001_s4  ;;  %p2202_p10 = scmp.eq.s32.totalorder %s1769_s15, 0 }
  0xcc   : > { %1642 = dma.done.wait (%p2202_p10), [#allocation11], 2048   ;;  %p2203_p5 = pmov %p2202_p10 }
  0xce   : > { %1644 = vsyncadd (%p2203_p5), [#allocation11], 4294965248  ;;  %p2204_p9 = pmov %p2203_p5 }
  0xcf   : > { %p2205_p2 = pmov %p2203_p5 }
  0xd0   : > { %1646 = dma.done.wait (%p2204_p9), [#allocation14], 1024  }
  0xd1   : > { %1648 = vsyncadd (%p2205_p2), [#allocation14], 4294966272  ;;  %v1685_v0 = vmov 0.0   ;;  %vm1686_vm0 = vmmov 0   ;;  %v1379_v1 = vld [vmem:[#allocation12] sm:$0xff]   ;;  %v1380_v2 = vld [vmem:[#allocation12 + $0x8] sm:$0xff]  }
  0xd2   : > { %1200 = vmatprep.subr.bf16.mxu0 %v1685_v0  ;;  %1216 = vmatprep.mubr.msk.bf16.mxu0 %vm1686_vm0, %v1685_v0  ;;  %v1381_v3 = vld [vmem:[#allocation12 + $0x10] sm:$0xff]   ;;  %v1382_v4 = vld [vmem:[#allocation12 + $0x18] sm:$0xff]   ;;  %v1383_v5 = vld [vmem:[#allocation12 + $0x20] sm:$0xff]   ;;  %s2206_s26 = sld [smem:[#allocation31_spill]]  ;;  %s2207_s16 = sld [smem:[#allocation32_spill]]  ;;  %vm898_vm1 = vcmask 1043456  }
  0xd3   : > { %1220 = vmatprep.subr.bf16.mxu1 %v1685_v0  ;;  %1236 = vmatprep.mubr.msk.bf16.mxu1 %vm1686_vm0, %v1685_v0  ;;  %v1395_v6 = vld [vmem:[#allocation13] sm:$0xff]   ;;  %v1384_v7 = vld [vmem:[#allocation12 + $0x28] sm:$0xff]   ;;  %v1385_v9 = vld [vmem:[#allocation12 + $0x30] sm:$0xff]   ;;  %vm881_vm2 = vcmask 64512   ;;  %s2208_s18 = sld [smem:[#allocation22_spill]]  ;;  %s2209_s24 = sld [smem:[#allocation27_spill]] }
  0xd4   : > { %1201 = vmatpush3.bf16.msra.mxu0 %v1379_v1  ;;  %1221 = vmatpush3.bf16.msra.mxu1 %v1395_v6  ;;  %v1396_v8 = vld [vmem:[#allocation13 + $0x8] sm:$0xff]   ;;  %v1397_v10 = vld [vmem:[#allocation13 + $0x10] sm:$0xff]   ;;  %v1386_v11 = vld [vmem:[#allocation12 + $0x38] sm:$0xff]   ;;  %s1136_s9 = sshll.u32 %s1998_s3, 3  ;;  %s2210_s4 = sld [smem:[#allocation33_spill]] }
  0xd5   : > { %1202 = vmatprep.subr.bf16.mxu0 %v1685_v0  ;;  %1222 = vmatprep.subr.bf16.mxu1 %v1685_v0  ;;  %v1398_v12 = vld [vmem:[#allocation13 + $0x18] sm:$0xff]   ;;  %v499_v13 = vld [vmem:[%s426_s25] sm:$0xf]  ;;  %v1387_v14 = vld [vmem:[#allocation10] sm:$0xff]   ;;  %s491_s23 = scalar_lea.vmem [#allocation15], %s1136_s9  ;;  %s1687_s19 = smov [#allocation15]  }
  0xd6   : > { %v1399_v15 = vld [vmem:[#allocation13 + $0x20] sm:$0xff]   ;;  %v1388_v16 = vld [vmem:[#allocation10 + $0x8] sm:$0xff]   ;;  %v1389_v18 = vld [vmem:[#allocation10 + $0x10] sm:$0xff]   ;;  %s959_s21 = sshll.u32 %s491_s23, 4  ;;  %s1585_s25 = sshll.u32 %s1687_s19, 4  ;;  %s2080_s21 = int_to_ptr.vmem [resolvable:$true] %s959_s21  ;;  %s1586_s25 = int_to_ptr.vmem [resolvable:$false] %s1585_s25 }
  0xd7   : > { %v1400_v17 = vld [vmem:[#allocation13 + $0x28] sm:$0xff]   ;;  %v1390_v19 = vld [vmem:[#allocation10 + $0x18] sm:$0xff]   ;;  %v1391_v20 = vld [vmem:[#allocation10 + $0x20] sm:$0xff]   ;;  %s1581_s30 = scalar_lea.vmem %s2080_s21, 128  ;;  %p1588_p13 = scmp.lt.s32.totalorder %s2080_s21, %s1586_s25 }
  0xd8   : > { %1203 = vmatpush3.bf16.msra.mxu0 %v1380_v2  ;;  %1223 = vmatpush3.bf16.msra.mxu1 %v1396_v8  ;;  %v1392_v21 = vld [vmem:[#allocation10 + $0x28] sm:$0xff]   ;;  %v1393_v22 = vld [vmem:[#allocation10 + $0x30] sm:$0xff]   ;;  %v1394_v23 = vld [vmem:[#allocation10 + $0x38] sm:$0xff]   ;;  %p1582_p4 = scmp.ne.s32.totalorder %s2080_s21, %s1581_s30 }
  0xd9   : > { %1204 = vmatprep.subr.bf16.mxu0 %v1685_v0  ;;  %1224 = vmatprep.subr.bf16.mxu1 %v1685_v0  ;;  %v727_v24 = vld [vmem:[%s417_s12] sm:$0xf]  ;;  %v1401_v25 = vld [vmem:[#allocation13 + $0x30] sm:$0xff]   ;;  %v1402_v26 = vld [vmem:[#allocation13 + $0x38] sm:$0xff]   ;;  %s1166_s27 = sshll.u32 %s2208_s18, 7  ;;  %s944_s12 = scalar_lea.sflag [#allocation6], %s1998_s3 }
  0xda   : > { %v611_v27 = vld [vmem:[%s435_s29] sm:$0xf]  ;;  %v1137_v28 = vld [vmem:[%s2138_s6] ss:$0 sm:$0xff]  ;;  %s2085_s8 = scalar_lea.hbm %s2210_s4, %s1166_s27  ;;  %p2211_p7 = scmp.ne.s32.totalorder %s2209_s24, 0 }
  0xdb   : > { %v1155_v36 = vld [vmem:[%s2206_s26] ss:$0 sm:$0xff]  ;;  %s1587_s29 = scalar_lea.vmem %s1586_s25, 256 }
  0xdc   : > { %1205 = vmatpush3.bf16.msra.mxu0 %v1381_v3  ;;  %1225 = vmatpush3.bf16.msra.mxu1 %v1397_v10  ;;  %v1146_v43 = vld [vmem:[%s2207_s16] ss:$0 sm:$0xff]  ;;  %p1583_p3 = pnand %p1582_p4, %p2211_p7  ;;  %p1589_p6 = scmp.lt.s32.totalorder %s1587_s29, %s1581_s30 }
  0xdd   : > { %1206 = vmatprep.subr.bf16.mxu0 %v1685_v0  ;;  %1226 = vmatprep.subr.bf16.mxu1 %v1685_v0 }
  0xde   : > { %p1584_p1 = pneg %p1583_p3  ;;  %p1590_p0 = por %p1589_p6, %p1588_p13 }
  0xe0   : > { %1207 = vmatpush3.bf16.msra.mxu0 %v1382_v4  ;;  %1227 = vmatpush3.bf16.msra.mxu1 %v1398_v12  ;;  %p1591_p12 = pnand %p1590_p0, %p1584_p1 }
  0xe1   : > { %1208 = vmatprep.subr.bf16.mxu0 %v1685_v0  ;;  %1228 = vmatprep.subr.bf16.mxu1 %v1685_v0 }
  0xe4   : > { %1209 = vmatpush3.bf16.msra.mxu0 %v1383_v5  ;;  %1229 = vmatpush3.bf16.msra.mxu1 %v1399_v15 }
  0xe5   : > { %1210 = vmatprep.subr.bf16.mxu0 %v1685_v0  ;;  %1230 = vmatprep.subr.bf16.mxu1 %v1685_v0 }
  0xe8   : > { %1211 = vmatpush3.bf16.msra.mxu0 %v1384_v7  ;;  %1231 = vmatpush3.bf16.msra.mxu1 %v1400_v17 }
  0xe9   : > { %1212 = vmatprep.subr.bf16.mxu0 %v1685_v0  ;;  %1232 = vmatprep.subr.bf16.mxu1 %v1685_v0 }
  0xec   : > { %1213 = vmatpush3.bf16.msra.mxu0 %v1385_v9  ;;  %1233 = vmatpush3.bf16.msra.mxu1 %v1401_v25 }
  0xed   : > { %1214 = vmatprep.subr.bf16.mxu0 %v1685_v0  ;;  %1234 = vmatprep.subr.bf16.mxu1 %v1685_v0 }
  0xf0   : > { %1215 = vmatpush3.bf16.msra.mxu0 %v1386_v11  ;;  %1235 = vmatpush3.bf16.msra.mxu1 %v1402_v26 }
  0xf1   : > { %1240 = vmatprep.subr.bf16.mxu0 %v1685_v0  ;;  %1260 = vmatprep.subr.bf16.mxu1 %v1685_v0 }
  0xf3   : > { %1217 = vmatmul.mubr.bf16.vlgmr.msra.gmra.mrb[0].mxu0 %v499_v13  ;;  %1237 = vmatmul.mubr.bf16.vlgmr.msra.gmra.mrb[0].mxu1 %v611_v27 }
  0xf4   : > { %1241 = vmatpush3.bf16.msra.mxu0 %v1387_v14  ;;  %1256 = vmatprep.mubr.msk.bf16.mxu0 %vm1686_vm0, %v1685_v0 }
  0xf5   : > { %1242 = vmatprep.subr.bf16.mxu0 %v1685_v0  ;;  %1262 = vmatprep.mubr.msk.bf16.mxu1 %vm1686_vm0, %v1685_v0 }
  0xf8   : > { %1243 = vmatpush3.bf16.msra.mxu0 %v1388_v16 }
  0xf9   : > { %1244 = vmatprep.subr.bf16.mxu0 %v1685_v0 }
  0xfc   : > { %1245 = vmatpush3.bf16.msra.mxu0 %v1389_v18 }
  0xfd   : > { %1246 = vmatprep.subr.bf16.mxu0 %v1685_v0 }
 0x100   : > { %1247 = vmatpush3.bf16.msra.mxu0 %v1390_v19 }
 0x101   : > { %1248 = vmatprep.subr.bf16.mxu0 %v1685_v0 }
 0x104   : > { %1249 = vmatpush3.bf16.msra.mxu0 %v1391_v20 }
 0x105   : > { %1250 = vmatprep.subr.bf16.mxu0 %v1685_v0 }
 0x108   : > { %1251 = vmatpush3.bf16.msra.mxu0 %v1392_v21 }
 0x109   : > { %1252 = vmatprep.subr.bf16.mxu0 %v1685_v0 }
 0x10c   : > { %1253 = vmatpush3.bf16.msra.mxu0 %v1393_v22 }
 0x10d   : > { %1254 = vmatprep.subr.bf16.mxu0 %v1685_v0 }
 0x110   : > { %1255 = vmatpush3.bf16.msra.mxu0 %v1394_v23 }
 0x113   : > { %1257 = vmatmul.mubr.bf16.vlgmr.msra.gmra.mrb[4].mxu0 %v727_v24 }
 0x1c6   : > { %v605_v29 = vpop.f32.mrb[0].mxu0  ;;  %v717_v44 = vpop.f32.mrb[0].mxu1 }
 0x1c7   : > { %v606_v30 = vadd.f32 %v1137_v28, %v605_v29  ;;  %v1218_v31 = vpop.f32.mrb[1].mxu0  ;;  %v718_v45 = vadd.f32 %v1146_v43, %v717_v44  ;;  %v1238_v46 = vpop.f32.mrb[1].mxu1 }
 0x1c8   : > { %v608_v32 = vpop.f32.mrb[2].mxu0  ;;  %v720_v47 = vpop.f32.mrb[2].mxu1 }
 0x1c9   : > { %v723_v33 = vpack.c.bf16 %v606_v30, %v606_v30  ;;  %v1219_v34 = vpop.f32.mrb[3].mxu0  ;;  %v725_v48 = vpack.c.bf16 %v718_v45, %v718_v45  ;;  %v1239_v49 = vpop.f32.mrb[3].mxu1 }
 0x1cb   : > { %724 = vst [vmem:[#allocation2] sm:$0xf] %v723_v33  ;;  %726 = vst [vmem:[#allocation3] sm:$0xf] %v725_v48 }
 0x1d2   : > { %v840_v35 = vld [vmem:[#allocation2] sm:$0xf]  ;;  %v894_v50 = vld [vmem:[#allocation3] sm:$0xf] }
 0x1d3   : > { %1261 = vmatpush3.bf16.xpose.msra.mxu1 %v840_v35  ;;  %v900_v51 = vsel %vm898_vm1, %v894_v50, 0 }
 0x1d4   : > { %1266 = vmatprep.subr.bf16.mxu1 %v1685_v0 }
 0x1e6   : > { %v833_v37 = vpop.f32.mrb[4].mxu0 }
 0x1e7   : > { %v834_v38 = vadd.f32 %v1155_v36, %v833_v37  ;;  %v1258_v39 = vpop.f32.mrb[5].mxu0 }
 0x1e8   : > { %v836_v40 = vpop.f32.mrb[6].mxu0 }
 0x1e9   : > { %v839_v41 = vpack.c.bf16 %v834_v38, %v834_v38  ;;  %v1259_v42 = vpop.f32.mrb[7].mxu0 }
 0x1eb   : > { %1263 = vmatmul.mubr.bf16.vlgmr.msra.gmra.mrb[4].mxu1 %v839_v41 }
 0x1ec   : > { %1268 = vmatprep.mubr.msk.bf16.mxu1 %vm1686_vm0, %v1685_v0  ;;  %1267 = vmatpush3.bf16.msra.mxu1 %v900_v51 }
 0x2be   : > { %v875_v52 = vpop.f32.mrb[4].mxu1 }
 0x2bf   : > { %v1264_v53 = vpop.f32.mrb[5].mxu1  ;;  %v882_v54 = vsel %vm881_vm2, %v875_v52, -inf }
 0x2c0   : > { %883 = vmax.xlane.f32.xlu0 %v882_v54  ;;  %v878_v55 = vpop.f32.mrb[6].mxu1 }
 0x2c1   : > { %v1265_v56 = vpop.f32.mrb[7].mxu1 }
 0x34d   : > { %v884_v57 = vpop.xlane.xlu0 %883 }
 0x34e   : > { %v885_v58 = vsub.f32 %v875_v52, %v884_v57 }
 0x350   : > { %v886_v59 = vmul.f32 1.442695, %v885_v58 }
 0x352   : > { %1403 = vpow2.f32 %v886_v59 }
 0x35c   : > { %v1404_v60 = vpop.eup %1403 }
 0x35d   : > { %v888_v61 = vsel %vm881_vm2, %v1404_v60, 0.0 }
 0x35e   : > { %889 = vadd.xlane.f32.xlu0 %v888_v61 }
 0x3eb   : > { %v890_v62 = vpop.xlane.xlu0 %889 }
 0x3ec   : > { %1405 = vrcp.f32 %v890_v62 }
 0x3f6   : > { %v1406_v63 = vpop.eup %1405 }
 0x3f7   : > { %v892_v0 = vmul.f32 %v1406_v63, %v1404_v60 }
 0x3f9   : > { %v893_v1 = vpack.c.bf16 %v892_v0, %v892_v0 }
 0x3fb   : > { %1269 = vmatmul.mubr.msk.bf16.vlgmr.msra.gmra.mrb[8].mxu1 %vm881_vm2, %v893_v1 }
 0x4ce   : > { %v936_v2 = vpop.f32.mrb[8].mxu1 }
 0x4cf   : > { %942 = vst [vmem:[%s491_s23] sm:$0xff] %v936_v2  ;;  %v1270_v3 = vpop.f32.mrb[9].mxu1 }
 0x4d0   : > { %v939_v4 = vpop.f32.mrb[10].mxu1 }
 0x4d1   : > { %1594 = shalt.err (!%p1591_p12)
}
 0x4d2   : > { %s1595_s3 = scalar_lea.hbm %s2085_s8, 128  ;;  %s1599_s22 = scalar_lea.hbm %s2210_s4, 256 }
 0x4d3   : > { %p1596_p8 = scmp.ne.s32.totalorder %s2085_s8, %s1595_s3  ;;  %p1600_p5 = scmp.lt.u32.totalorder %s2085_s8, %s2210_s4 }
 0x4d4   : > { %p1601_p9 = scmp.lt.u32.totalorder %s1599_s22, %s1595_s3  ;;  %p1603_p4 = scmp.lt.u32.totalorder %s1595_s3, %s2085_s8 }
 0x4d5   : > { %p1597_p11 = pnand %p1596_p8, %p2211_p7 }
 0x4d6   : > { %p1602_p2 = por %p1601_p9, %p1600_p5 }
 0x4d7   : > { %p1598_p10 = pneg %p1597_p11 }
 0x4d8   : > { %p1604_p3 = por %p1603_p4, %p1602_p2 }
 0x4da   : > { %p1605_p1 = pnand %p1604_p3, %p1598_p10 }
 0x4dc   : > { %1608 = shalt.err (!%p1605_p1)
}
 0x4dd   : > { %1290 = dma.vmem_to_hbm [thread:$0]  (%p2211_p7), %s2080_s21, 128, %s2085_s8, %s944_s12   ;;  %v1271_v5 = vpop.f32.mrb[11].mxu1 }
 0x4de PF: > { %s2212_s1 = sld [smem:[#allocation21_spill]]  ;;  %s2213_s13 = sld [smem:[#allocation25_spill]] }
 0x4df   : > { %s2214_s16 = sld [smem:[#allocation24_spill]] }
 0x4e4   : > { %s971_s18 = sand.u32 1, %s2212_s1   ;;  %p2215_p13 = scmp.ne.s32.totalorder %s2213_s13, 0 }
 0x4e5   : > { %p2216_p6 = scmp.ge.s32.totalorder %s2214_s16, 2  ;;  %s972_s9 = scalar_lea.sflag [#allocation6], %s971_s18 }
 0x4e7   : > { %p1313_p0 = pnand %p2216_p6, %p2215_p13 }
 0x4e9   : > { %1650 = dma.done.wait (!%p1313_p0), %s972_s9, 128  }
 0x4ea   : > { %1652 = vsyncadd (!%p1313_p0), %s972_s9, 4294967168  ;;  %s30_s14 = sadd.s32 1, %s2214_s16   ;;  %s2217_s24 = sld [smem:[#allocation28_spill]] }
 0x4eb   : > { %p27_p12 = scmp.ge.s32.totalorder %s30_s14, 4   ;;  %s2218_s12 = sld [smem:[#allocation23_spill]] }
 0x4ec   : > { %s2219_s13 = sld [smem:[#allocation26_spill]]  ;;  %s2220_s30 = smov %s1659_s10 }
 0x4ed   : > { %s2221_s10 = smov %s1663_s11  ;;  %29 = sbr.rel (!%p27_p12) target bundleno = 16 (0x10), region = 141 }
 0x4f0   : > { %s2222_s11 = smov %s2217_s24 }
 0x4f4   :  { %977 = vsyncpa [#allocation5], 1 }
 0x4f5   :  { %979 = vsyncpa [#allocation5 + $0x1], 1 }
 0x4f6   :  { %980 = vsyncpa [#allocation8], 1 }
 0x4f7   :  { %982 = vsyncpa [#allocation8 + $0x1], 1 }
 0x4f8   :  { %983 = vsyncpa [#allocation11], 1 }
 0x4f9   :  { %984 = vsyncpa [#allocation14], 1 }
 0x4fa   :  { %985 = vsyncpa [#allocation6], 1 }
 0x4fb   :  { %987 = vsyncpa [#allocation6 + $0x1], 1 }

</bundles_post_ra>
